<compile_context>
chip_gen: v7x
topology: tpu7x:2x2x1
jax: 0.10.0
libtpu: 0.0.40
codegen_flags: <defaults>
</compile_context>

<pallas_src>
import jax
import jax.numpy as jnp
from jax.experimental import pallas as pl
from jax.experimental.pallas import tpu as pltpu

LANE = 128      # vreg lane width
SUBLANE = 8     # f32 sublane count
TM_MAX = 4096   # rows per grid step: (4096, 128) f32 tile = 2 MiB per buffer
NUM_SPLITS = 2  # leading "parallel" axis -> TensorCore shards on v7x


def _make_kernel(*, tm: int, rows: int, bpc: int, needs_mask: bool):
    def kernel(ze_ref, zq_ref, out_ref):
        c = pl.program_id(0)   # parallel split (core shard on v7x)
        i = pl.program_id(1)   # reduction step within the split

        # The (1, 8, 128) output block is resident across the "arbitrary" axis:
        # it *is* the accumulator. Zero it on the first step of each split.
        @pl.when(i == 0)
        def _init():
            out_ref[...] = jnp.zeros_like(out_ref)

        d = zq_ref[...].astype(jnp.float32) - ze_ref[...].astype(jnp.float32)
        dd = d * d

        if needs_mask:
            # Zero out rows of the (single, trailing) partial block.
            row0 = (c * bpc + i) * tm
            row = row0 + jax.lax.broadcasted_iota(jnp.int32, (tm, LANE), 0)
            dd = jnp.where(row < rows, dd, 0.0)

        if tm % SUBLANE == 0:
            # Fold the (tm, 128) tile into the vreg-shaped accumulator with
            # pure VPU adds -- no per-step cross-lane/cross-sublane reduce.
            out_ref[...] += dd.reshape(tm // SUBLANE, SUBLANE, LANE).sum(
                axis=0, keepdims=True)
        else:
            # Tiny single-block fallback (rows < TM_MAX and rows % 8 != 0).
            out_ref[0, 0, 0] += jnp.sum(dd)

    return kernel


def codebook_loss(z_e: jax.Array, z_q: jax.Array, beta: float = 0.25) -> jax.Array:
    assert z_e.shape == z_q.shape, "z_e and z_q must have the same shape"
    n = z_e.size

    ze = z_e.reshape(-1)
    zq = z_q.reshape(-1)

    # Rare ragged tail (n % 128 != 0): zero-pad to a lane multiple; zero diffs
    # contribute nothing to the sum. The common NCHW case takes the free
    # reshape path with no HBM copy and no dtype upcast.
    pad = (-n) % LANE
    if pad:
        ze = jnp.pad(ze, (0, pad))
        zq = jnp.pad(zq, (0, pad))

    rows = (n + pad) // LANE
    ze2 = ze.reshape(rows, LANE)
    zq2 = zq.reshape(rows, LANE)

    tm = min(TM_MAX, rows)
    total_blocks = pl.cdiv(rows, tm)
    # Split across TensorCores (v7x) only when the blocks divide evenly so the
    # index map stays a plain affine function of the grid indices.
    n_splits = NUM_SPLITS if (total_blocks >= NUM_SPLITS and
                              total_blocks % NUM_SPLITS == 0) else 1
    bpc = total_blocks // n_splits            # row-blocks per split
    needs_mask = (rows % tm) != 0             # only the last block can be partial

    bytes_accessed = n * (jnp.dtype(z_e.dtype).itemsize +
                          jnp.dtype(z_q.dtype).itemsize)
    cost = pl.CostEstimate(flops=3 * n, transcendentals=0,
                           bytes_accessed=bytes_accessed)

    partials = pl.pallas_call(
        _make_kernel(tm=tm, rows=rows, bpc=bpc, needs_mask=needs_mask),
        out_shape=jax.ShapeDtypeStruct((n_splits, SUBLANE, LANE), jnp.float32),
        grid_spec=pltpu.PrefetchScalarGridSpec(
            num_scalar_prefetch=0,
            grid=(n_splits, bpc),
            in_specs=[
                pl.BlockSpec((tm, LANE), lambda c, i: (c * bpc + i, 0)),
                pl.BlockSpec((tm, LANE), lambda c, i: (c * bpc + i, 0)),
            ],
            out_specs=pl.BlockSpec((1, SUBLANE, LANE), lambda c, i: (c, 0, 0)),
        ),
        compiler_params=pltpu.CompilerParams(
            dimension_semantics=("parallel", "arbitrary"),
        ),
        cost_estimate=cost,
    )(ze2, zq2)

    # embedding_loss == commitment_loss numerically for the forward value;
    # fold (1 + beta) / n into a single scale applied once to the tiny
    # (n_splits, 8, 128) partial-sum output.
    scale = (1.0 + float(beta)) / float(n)
    return jnp.sum(partials) * jnp.float32(scale)


if __name__ == "__main__":
    key = jax.random.PRNGKey(0)
    k1, k2, k3, k4 = jax.random.split(key, 4)
    beta = 0.25

    # Small NCHW shapes consistent with an encoded image: (B=2, C=4, H=16, W=16)
    z_e = jax.random.normal(k1, (2, 4, 16, 16), dtype=jnp.float32)
    z_q = jax.random.normal(k2, (2, 4, 16, 16), dtype=jnp.float32)

    loss = jax.block_until_ready(codebook_loss(z_e, z_q, beta=beta))
    mse = jnp.mean((z_q - z_e) ** 2)
    ref = mse + beta * mse
    assert jnp.allclose(loss, ref, rtol=1e-5, atol=1e-6), (loss, ref)

    # Moderate shape exercising multi-block tiling, the 2-way core split and
    # the partial-tail row mask (rows = 6000 > TM_MAX).
    z_e2 = jax.random.normal(k3, (2, 30, 100, 128), dtype=jnp.float32)
    z_q2 = jax.random.normal(k4, (2, 30, 100, 128), dtype=jnp.float32)
    loss2 = jax.block_until_ready(codebook_loss(z_e2, z_q2, beta=beta))
    mse2 = jnp.mean((z_q2 - z_e2) ** 2)
    ref2 = mse2 + beta * mse2
    assert jnp.allclose(loss2, ref2, rtol=1e-4, atol=1e-6), (loss2, ref2)

    print("KERNEL_OK")
</pallas_src>

<mosaic_0001>
module attributes {stable_mosaic.version = 11 : i64} {
  func.func @kernel(%arg0: i32, %arg1: i32, %arg2: memref<16x128xf32, #tpu.memory_space<vmem>>, %arg3: memref<16x128xf32, #tpu.memory_space<vmem>>, %arg4: memref<1x8x128xf32, #tpu.memory_space<vmem>>) attributes {dimension_semantics = [#tpu.dimension_semantics<parallel>, #tpu.dimension_semantics<arbitrary>], iteration_bounds = array<i64: 1, 1>, scalar_prefetch = 0 : i64, scratch_operands = 0 : i64, tpu.core_type = #tpu.core_type<tc>, window_params = [{transform_indices = @transform_0, window_bounds = array<i64: 16, 128>}, {transform_indices = @transform_1, window_bounds = array<i64: 16, 128>}, {transform_indices = @transform_2, window_bounds = array<i64: 1, 8, 128>}]} {
    %c0_i32 = arith.constant 0 : i32
    %0 = arith.cmpi eq, %arg1, %c0_i32 : i32
    %1 = arith.extui %0 : i1 to i32
    %c0_i32_0 = arith.constant 0 : i32
    %2 = arith.cmpi ne, %1, %c0_i32_0 : i32
    scf.if %2 {
      %cst_10 = arith.constant 0.000000e+00 : f32
      %13 = vector.broadcast %cst_10 : f32 to vector<1x8x128xf32>
      %c0_11 = arith.constant 0 : index
      %c0_12 = arith.constant 0 : index
      %c0_13 = arith.constant 0 : index
      %14 = vector.load %arg4[%c0_11, %c0_12, %c0_13] : memref<1x8x128xf32, #tpu.memory_space<vmem>>, vector<1x8x128xf32>
      tpu.vector_store %arg4[%c0_11, %c0_12, %c0_13], %13 {strides = array<i32>} : memref<1x8x128xf32, #tpu.memory_space<vmem>>, vector<1x8x128xf32>,
    } else {
    }
    %c0 = arith.constant 0 : index
    %c0_1 = arith.constant 0 : index
    %3 = vector.load %arg3[%c0, %c0_1] : memref<16x128xf32, #tpu.memory_space<vmem>>, vector<16x128xf32>
    %c0_2 = arith.constant 0 : index
    %c0_3 = arith.constant 0 : index
    %4 = vector.load %arg2[%c0_2, %c0_3] : memref<16x128xf32, #tpu.memory_space<vmem>>, vector<16x128xf32>
    %5 = arith.subf %3, %4 : vector<16x128xf32>
    %6 = arith.mulf %5, %5 : vector<16x128xf32>
    %c0_4 = arith.constant 0 : index
    %c0_5 = arith.constant 0 : index
    %c0_6 = arith.constant 0 : index
    %7 = vector.load %arg4[%c0_4, %c0_5, %c0_6] : memref<1x8x128xf32, #tpu.memory_space<vmem>>, vector<1x8x128xf32>
    %8 = vector.shape_cast %6 : vector<16x128xf32> to vector<2x8x128xf32>
    %cst = arith.constant dense<0.000000e+00> : vector<8x128xf32>
    %9 = vector.multi_reduction <add>, %8, %cst [0] : vector<2x8x128xf32> to vector<8x128xf32>
    %10 = vector.shape_cast %9 : vector<8x128xf32> to vector<1x8x128xf32>
    %11 = arith.addf %7, %10 : vector<1x8x128xf32>
    %c0_7 = arith.constant 0 : index
    %c0_8 = arith.constant 0 : index
    %c0_9 = arith.constant 0 : index
    %12 = vector.load %arg4[%c0_7, %c0_8, %c0_9] : memref<1x8x128xf32, #tpu.memory_space<vmem>>, vector<1x8x128xf32>
    tpu.vector_store %arg4[%c0_7, %c0_8, %c0_9], %11 {strides = array<i32>} : memref<1x8x128xf32, #tpu.memory_space<vmem>>, vector<1x8x128xf32>,
    return
  }
  func.func @transform_0(%arg0: i32, %arg1: i32) -> (i32, i32) {
    %c1_i32 = arith.constant 1 : i32
    %0 = arith.muli %arg0, %c1_i32 : i32
    %1 = arith.addi %0, %arg1 : i32
    %c0_i32 = arith.constant 0 : i32
    %c0_i32_0 = arith.constant 0 : i32
    return %1, %c0_i32 : i32, i32
  }
  func.func @transform_1(%arg0: i32, %arg1: i32) -> (i32, i32) {
    %c1_i32 = arith.constant 1 : i32
    %0 = arith.muli %arg0, %c1_i32 : i32
    %1 = arith.addi %0, %arg1 : i32
    %c0_i32 = arith.constant 0 : i32
    %c0_i32_0 = arith.constant 0 : i32
    return %1, %c0_i32 : i32, i32
  }
  func.func @transform_2(%arg0: i32, %arg1: i32) -> (i32, i32, i32) {
    %c0_i32 = arith.constant 0 : i32
    %c0_i32_0 = arith.constant 0 : i32
    %c0_i32_1 = arith.constant 0 : i32
    return %arg0, %c0_i32, %c0_i32_0 : i32, i32, i32
  }
}

</mosaic_0001>

<bundles_post_ra>
// kernel: tpu_custom_call.1
= control target key start
LH: loop header
LB: loop body
LE: loop exit
PB: predicated region body
PF: predicated region fallthrough
CT: control target
= control target key end

     0   :  { %7 = vsyncpa [#allocation3], 0  ;;  %s219_s0 = inlined_call_operand.hbm [shape: f32[16,128], index: 0, kind: input, shape index: {}]   ;;  %s220_s1 = inlined_call_operand.hbm [shape: f32[16,128], index: 1, kind: input, shape index: {}]   ;;  %s221_s2 = inlined_call_operand.hbm [shape: f32[1,8,128], index: 2, kind: output, shape index: {}]  }
   0x1   :  { %8 = vsyncpa [#allocation6], 0 }
   0x2   :  { %9 = vsyncpa [#allocation4], 0  ;;  %s163_s9 = smov [#allocation2]   ;;  %s91_s13 = scalar_lea.hbm %s219_s0, 256 }
   0x3   :  { %s19_s10 = sshll.u32 %s163_s9, 4  ;;  %p92_p0 = scmp.ne.s32.totalorder %s219_s0, %s91_s13  ;;  %s20_s10 = int_to_ptr.vmem [resolvable:$true] %s19_s10 }
   0x4   :  { %p95_p1 = scmp.lt.u32.totalorder %s91_s13, %s219_s0 }
   0x6   :  { %p97_p2 = pnand %p95_p1, %p92_p0 }
   0x8   :  { %100 = shalt.err (!%p97_p2)
}
   0x9   :  { %s101_s18 = scalar_lea.vmem %s20_s10, 256  ;;  %p106_p4 = scmp.lt.s32.totalorder %s20_s10, %s20_s10 }
   0xa   :  { %p102_p3 = scmp.ne.s32.totalorder %s20_s10, %s101_s18  ;;  %p107_p5 = scmp.lt.s32.totalorder %s101_s18, %s101_s18 }
   0xc   :  { %p108_p6 = por %p107_p5, %p106_p4 }
   0xe   :  { %p109_p7 = pnand %p108_p6, %p102_p3 }
  0x10   :  { %112 = shalt.err (!%p109_p7)
}
  0x11   :  { %s164_s19 = smov 128   ;;  %s165_s20 = smov 8  }
  0x12   :  { %25 = dma.hbm_to_vmem [thread:$0]  %s219_s0, 256, %s20_s10, [#allocation3], %s164_s19, %s164_s19, %s165_s20  }
  0x13   :  { %s166_s23 = smov [#allocation5]   ;;  %s113_s27 = scalar_lea.hbm %s220_s1, 256 }
  0x14   :  { %s35_s24 = sshll.u32 %s166_s23, 4  ;;  %p114_p8 = scmp.ne.s32.totalorder %s220_s1, %s113_s27  ;;  %s36_s24 = int_to_ptr.vmem [resolvable:$true] %s35_s24 }
  0x15   :  { %p117_p9 = scmp.lt.u32.totalorder %s113_s27, %s220_s1 }
  0x17   :  { %p119_p10 = pnand %p117_p9, %p114_p8 }
  0x19   :  { %122 = shalt.err (!%p119_p10)
}
  0x1a   :  { %s123_s4 = scalar_lea.vmem %s36_s24, 256  ;;  %p128_p12 = scmp.lt.s32.totalorder %s36_s24, %s36_s24 }
  0x1b   :  { %p124_p11 = scmp.ne.s32.totalorder %s36_s24, %s123_s4  ;;  %p129_p13 = scmp.lt.s32.totalorder %s123_s4, %s123_s4 }
  0x1d   :  { %p130_p0 = por %p129_p13, %p128_p12 }
  0x1f   :  { %p131_p1 = pnand %p130_p0, %p124_p11 }
  0x21   :  { %134 = shalt.err (!%p131_p1)
}
  0x22   :  { %41 = dma.hbm_to_vmem [thread:$0]  %s220_s1, 256, %s36_s24, [#allocation6], %s164_s19, %s164_s19, %s165_s20  }
  0x23   :  { %157 = dma.done.wait [#allocation3], 256  }
  0x24   :  { %158 = vsyncadd [#allocation3], 4294967040 }
  0x25   :  { %159 = dma.done.wait [#allocation6], 256  }
  0x26   :  { %160 = vsyncadd [#allocation6], 4294967040  ;;  %v57_v0 = vld [vmem:[#allocation5] sm:$0xff]  ;;  %v58_v1 = vld [vmem:[#allocation5 + $0x8] sm:$0xff]  ;;  %s167_s6 = smov [#allocation7]  }
  0x27   :  { %v59_v2 = vld [vmem:[#allocation2] sm:$0xff]  ;;  %v60_v3 = vld [vmem:[#allocation2 + $0x8] sm:$0xff]  ;;  %s75_s7 = sshll.u32 %s167_s6, 4  ;;  %s76_s7 = int_to_ptr.vmem [resolvable:$true] %s75_s7 }
  0x28   :  { %v61_v4 = vsub.f32 %v57_v0, %v59_v2  ;;  %v62_v5 = vsub.f32 %v58_v1, %v60_v3  ;;  %s135_s8 = scalar_lea.vmem %s76_s7, 128  ;;  %p140_p3 = scmp.lt.s32.totalorder %s76_s7, %s76_s7 }
  0x29   :  { %p136_p2 = scmp.ne.s32.totalorder %s76_s7, %s135_s8  ;;  %p141_p4 = scmp.lt.s32.totalorder %s135_s8, %s135_s8 }
  0x2a   :  { %v63_v6 = vmul.f32 %v61_v4, %v61_v4  ;;  %v64_v7 = vmul.f32 %v62_v5, %v62_v5 }
  0x2b   :  { %p142_p5 = por %p141_p4, %p140_p3 }
  0x2c   :  { %v66_v8 = vadd.f32 %v64_v7, %v63_v6 }
  0x2d   :  { %p143_p6 = pnand %p142_p5, %p136_p2 }
  0x2e   :  { %68 = vst [vmem:[#allocation7] sm:$0xff] %v66_v8 }
  0x2f   :  { %146 = shalt.err (!%p143_p6)
}
  0x30   :  { %s147_s10 = scalar_lea.hbm %s221_s2, 128 }
  0x31   :  { %p148_p7 = scmp.ne.s32.totalorder %s221_s2, %s147_s10  ;;  %p151_p8 = scmp.lt.u32.totalorder %s147_s10, %s221_s2 }
  0x33   :  { %p153_p9 = pnand %p151_p8, %p148_p7 }
  0x35   :  { %156 = shalt.err (!%p153_p9)
}
  0x36   :  { %78 = dma.vmem_to_hbm [thread:$0]  %s76_s7, 128, %s221_s2, [#allocation4]  }
  0x37   :  { %161 = dma.done.wait [#allocation4], 128  }
  0x38   :  { %162 = vsyncadd [#allocation4], 4294967168 }
  0x39   :  { %82 = vsyncpa [#allocation3], 1 }
  0x3a   :  { %83 = vsyncpa [#allocation6], 1 }
  0x3b   :  { %84 = vsyncpa [#allocation4], 1 }

</bundles_post_ra>
